<compile_context>
chip_gen: v6e
topology: v6e:2x2x1
jax: 0.10.0
libtpu: 0.0.40
codegen_flags: <defaults>
</compile_context>

<pallas_src>
import functools

import jax
import jax.numpy as jnp
from jax import lax
from jax.experimental import pallas as pl
from jax.experimental.pallas import tpu as pltpu

GROUPS = 4
NEG_SLOPE = 0.2
EPS = 1e-5


def _round_up(a, b):
    return (a + b - 1) // b * b


def _dcgan_conv_kernel(xflat_ref, w_ref, b_ref, g_ref, bt_ref, m_ref, mask_ref,
                       o_ref, patch_ref, *, stride, cin_p, ho, wo, wph):
    """One batch sample per grid step.

    xflat_ref: (1, s*s*cin_p, Hph*Wph)  phase-split, zero-padded, channel-major
    w_ref:     (Cout, 9*cin_p)          conv weight, K ordered (ky, kx, c)
    b_ref/g_ref/bt_ref: (Cout, 1)       conv bias / GN weight / GN bias (f32)
    m_ref:     (Cout, Cout)             group-membership matrix (resident)
    mask_ref:  (1, P2)                  1.0 at valid spatial columns, else 0.0
    o_ref:     (1, Cout, P2)            NCHW-flat output, P2 = 128-multiple
    patch_ref: (9*cin_p, P2)            VMEM im2col scratch
    """
    s = stride
    l_cols = (ho - 1) * wph + wo                       # written scratch columns

    # ---- im2col into VMEM: 9 tile-aligned sub-copies, K on sublanes --------
    patch_ref[...] = jnp.zeros_like(patch_ref)          # keep tail lanes finite
    for ky in range(3):
        for kx in range(3):
            pidx = (ky % s) * s + (kx % s)               # stride phase
            qy, qx = ky // s, kx // s                    # offset inside phase
            t = ky * 3 + kx
            start = qy * wph + qx
            patch_ref[t * cin_p:(t + 1) * cin_p, :l_cols] = (
                xflat_ref[0, pidx * cin_p:(pidx + 1) * cin_p,
                          start:start + l_cols])

    # ---- single MXU matmul: (Cout, K) x (K, P2) -> f32 (Cout, P2) ----------
    acc = jnp.dot(w_ref[...], patch_ref[...],
                  preferred_element_type=jnp.float32)

    # ---- GroupNorm(4, Cout), one-pass stats; conv bias folded into scalars --
    pv = float(ho * wo)                                  # valid spatial count
    cg = acc.shape[0] // GROUPS
    inv_n = 1.0 / (pv * cg)
    b = b_ref[...]
    am = acc * mask_ref[...]                             # junk columns -> 0
    s1 = jnp.sum(am, axis=1, keepdims=True)              # (Cout, 1)
    s2 = jnp.sum(am * am, axis=1, keepdims=True)         # (Cout, 1)
    s1b = s1 + pv * b                                    # stats of (acc + bias)
    s2b = s2 + 2.0 * b * s1 + pv * (b * b)
    mean = jnp.dot(m_ref[...], s1b, preferred_element_type=jnp.float32) * inv_n
    ex2 = jnp.dot(m_ref[...], s2b, preferred_element_type=jnp.float32) * inv_n
    var = ex2 - mean * mean
    scale = g_ref[...] * lax.rsqrt(var + EPS)
    shift = (b - mean) * scale + bt_ref[...]

    # ---- fused affine + LeakyReLU(0.2); lane-dense store -------------------
    y = acc * scale + shift
    o_ref[0] = jnp.maximum(y, NEG_SLOPE * y)


@functools.partial(jax.jit, static_argnames=("stride", "compute_dtype"))
def dcgan_conv_forward(x_nchw, weight, bias, gamma, beta, *, stride,
                       compute_dtype=jnp.float32):
    """Matches torch dcgan_conv.forward: NCHW float32 in / NCHW float32 out."""
    n, cin, h, w = x_nchw.shape
    cout = weight.shape[0]
    if cout % GROUPS != 0:
        raise ValueError(f"GroupNorm({GROUPS}, {cout}) requires cout % {GROUPS} == 0")
    s = int(stride)
    if s not in (1, 2):
        raise ValueError("dcgan_conv kernel supports stride 1 or 2 only")

    itemsize = jnp.dtype(compute_dtype).itemsize
    sub = 8 * (4 // itemsize)              # sublane tile: 8 (f32) / 16 (bf16)
    cin_p = _round_up(cin, sub)            # aligned im2col writes

    ho = (h + 2 - 3) // s + 1
    wo = (w + 2 - 3) // s + 1
    hph = ho + 2 // s
    wph = wo + 2 // s
    hp, wp = s * hph, s * wph
    fdim = hph * wph                       # flattened spatial per phase
    p2 = _round_up(ho * wph, 128)          # lane-dense output width
    k_rows = 9 * cin_p

    # Pad in NCHW: 1-px halo (extended so the padded extent is s*Hph x s*Wph)
    # plus zero channels up to cin_p.
    xpad = jnp.pad(x_nchw, ((0, 0), (0, cin_p - cin),
                            (1, hp - h - 1), (1, wp - w - 1)))
    if s == 1:
        xflat = xpad.reshape(n, cin_p, fdim)
    else:
        # One combined permute: (N, C, Hph, s, Wph, s) -> (N, s, s, C, Hph, Wph)
        xflat = (xpad.reshape(n, cin_p, hph, s, wph, s)
                 .transpose(0, 3, 5, 1, 2, 4)
                 .reshape(n, s * s * cin_p, fdim))
    xflat = xflat.astype(compute_dtype)

    # weight (Cout, Cin, 3, 3) -> (Cout, 9*cin_p), K ordered (ky, kx, c).
    wpad = jnp.pad(weight, ((0, 0), (0, cin_p - cin), (0, 0), (0, 0)))
    w_flat = jnp.transpose(wpad, (0, 2, 3, 1)).reshape(cout, k_rows)
    w_flat = w_flat.astype(compute_dtype)

    b2 = bias.reshape(cout, 1).astype(jnp.float32)
    g2 = gamma.reshape(cout, 1).astype(jnp.float32)
    bt2 = beta.reshape(cout, 1).astype(jnp.float32)
    cg = cout // GROUPS
    mgrp = jnp.kron(jnp.eye(GROUPS, dtype=jnp.float32),
                    jnp.ones((cg, cg), jnp.float32))            # (Cout, Cout)
    col = jnp.arange(p2, dtype=jnp.int32)
    mask = (((col % wph) < wo) & (col < ho * wph)).astype(jnp.float32)
    mask = mask.reshape(1, p2)

    kernel = functools.partial(_dcgan_conv_kernel, stride=s, cin_p=cin_p,
                               ho=ho, wo=wo, wph=wph)

    # VMEM budget: double-buffered input/output blocks + scratch + constants.
    xblk = _round_up(s * s * cin_p, sub) * _round_up(fdim, 128) * itemsize
    oblk = _round_up(cout, 8) * p2 * 4
    scratch_b = _round_up(k_rows, sub) * p2 * itemsize
    const_b = (_round_up(cout, sub) * _round_up(k_rows, 128) * itemsize
               + 6 * 8 * max(p2, 128) * 4)
    needed = 2 * xblk + 2 * oblk + scratch_b + 2 * const_b + (4 << 20)
    vmem_limit = int(min(64 << 20, max(needed, 16 << 20)))

    cost = pl.CostEstimate(
        flops=2 * n * cout * k_rows * p2 + 4 * n * cout * cout,
        transcendentals=n * cout,
        bytes_accessed=(n * s * s * cin_p * fdim * itemsize
                        + cout * k_rows * itemsize + n * cout * p2 * 4))

    out_flat = pl.pallas_call(
        kernel,
        out_shape=jax.ShapeDtypeStruct((n, cout, p2), jnp.float32),
        grid_spec=pltpu.PrefetchScalarGridSpec(
            num_scalar_prefetch=0,
            grid=(n,),
            in_specs=[
                pl.BlockSpec((1, s * s * cin_p, fdim), lambda i: (i, 0, 0)),
                pl.BlockSpec((cout, k_rows), lambda i: (0, 0)),
                pl.BlockSpec((cout, 1), lambda i: (0, 0)),
                pl.BlockSpec((cout, 1), lambda i: (0, 0)),
                pl.BlockSpec((cout, 1), lambda i: (0, 0)),
                pl.BlockSpec((cout, cout), lambda i: (0, 0)),
                pl.BlockSpec((1, p2), lambda i: (0, 0)),
            ],
            out_specs=pl.BlockSpec((1, cout, p2), lambda i: (i, 0, 0)),
            scratch_shapes=[pltpu.VMEM((k_rows, p2), compute_dtype)],
        ),
        compiler_params=pltpu.CompilerParams(
            dimension_semantics=("parallel",),
            vmem_limit_bytes=vmem_limit),
        cost_estimate=cost,
    )(xflat, w_flat, b2, g2, bt2, mgrp, mask)

    # Output is already channel-major (NCHW-flat); drop lane padding / junk cols.
    out = out_flat[:, :, :ho * wph].reshape(n, cout, ho, wph)[:, :, :, :wo]
    return out


def _reference(x_nchw, weight, bias, gamma, beta, stride):
    """Plain-JAX reference (conv -> GroupNorm(4) -> LeakyReLU) in NCHW."""
    y = lax.conv_general_dilated(
        x_nchw, weight, window_strides=(stride, stride),
        padding=((1, 1), (1, 1)),
        dimension_numbers=("NCHW", "OIHW", "NCHW"))
    y = y + bias.reshape(1, -1, 1, 1)
    n, c, h, w = y.shape
    yg = y.reshape(n, GROUPS, c // GROUPS, h, w)
    mean = jnp.mean(yg, axis=(2, 3, 4), keepdims=True)
    var = jnp.mean((yg - mean) ** 2, axis=(2, 3, 4), keepdims=True)
    yn = ((yg - mean) / jnp.sqrt(var + EPS)).reshape(n, c, h, w)
    yn = yn * gamma.reshape(1, -1, 1, 1) + beta.reshape(1, -1, 1, 1)
    return jnp.where(yn >= 0, yn, NEG_SLOPE * yn)


if __name__ == "__main__":
    key = jax.random.PRNGKey(0)
    n, cin, h, w = 2, 4, 16, 16
    cout = 8                               # divisible by 4 for GroupNorm(4, nout)

    kx_, kw_, kb_ = jax.random.split(key, 3)
    x = jax.random.normal(kx_, (n, cin, h, w), dtype=jnp.float32)
    weight = 0.1 * jax.random.normal(kw_, (cout, cin, 3, 3), dtype=jnp.float32)
    bias = 0.05 * jax.random.normal(kb_, (cout,), dtype=jnp.float32)
    gamma = jnp.ones((cout,), dtype=jnp.float32)   # GroupNorm default affine init
    beta = jnp.zeros((cout,), dtype=jnp.float32)

    # f32 path, both strides used by dcgan_conv in PhyDNet.
    for stride in (2, 1):
        out = dcgan_conv_forward(x, weight, bias, gamma, beta, stride=stride)
        out = jax.block_until_ready(out)
        ref = _reference(x, weight, bias, gamma, beta, stride)
        assert out.shape == (n, cout, h // stride, w // stride), out.shape
        err = float(jnp.max(jnp.abs(out - ref)))
        assert err < 1e-4, (stride, err)

    # bf16 MXU operands (recommended on v6e/v7x); accumulation + GroupNorm in f32.
    out_bf = dcgan_conv_forward(x, weight, bias, gamma, beta, stride=2,
                                compute_dtype=jnp.bfloat16)
    out_bf = jax.block_until_ready(out_bf)
    ref2 = _reference(x, weight, bias, gamma, beta, 2)
    assert float(jnp.max(jnp.abs(out_bf - ref2))) < 5e-2

    print("KERNEL_OK")
</pallas_src>

<mosaic_0001>
module attributes {stable_mosaic.version = 11 : i64} {
  func.func @_dcgan_conv_kernel(%arg0: i32, %arg1: memref<1x32x81xf32, #tpu.memory_space<vmem>>, %arg2: memref<8x72xf32, #tpu.memory_space<vmem>>, %arg3: memref<8x1xf32, #tpu.memory_space<vmem>>, %arg4: memref<8x1xf32, #tpu.memory_space<vmem>>, %arg5: memref<8x1xf32, #tpu.memory_space<vmem>>, %arg6: memref<8x8xf32, #tpu.memory_space<vmem>>, %arg7: memref<1x128xf32, #tpu.memory_space<vmem>>, %arg8: memref<1x8x128xf32, #tpu.memory_space<vmem>>, %arg9: memref<72x128xf32, #tpu.memory_space<vmem>>) attributes {dimension_semantics = [#tpu.dimension_semantics<parallel>], iteration_bounds = array<i64: 2>, scalar_prefetch = 0 : i64, scratch_operands = 1 : i64, tpu.core_type = #tpu.core_type<tc>, window_params = [{transform_indices = @transform_0, window_bounds = array<i64: 1, 32, 81>}, {pipeline_mode = #tpu.pipeline_mode<synchronous>, transform_indices = @transform_1, window_bounds = array<i64: 8, 72>}, {pipeline_mode = #tpu.pipeline_mode<synchronous>, transform_indices = @transform_2, window_bounds = array<i64: 8, 1>}, {pipeline_mode = #tpu.pipeline_mode<synchronous>, transform_indices = @transform_3, window_bounds = array<i64: 8, 1>}, {pipeline_mode = #tpu.pipeline_mode<synchronous>, transform_indices = @transform_4, window_bounds = array<i64: 8, 1>}, {pipeline_mode = #tpu.pipeline_mode<synchronous>, transform_indices = @transform_5, window_bounds = array<i64: 8, 8>}, {pipeline_mode = #tpu.pipeline_mode<synchronous>, transform_indices = @transform_6, window_bounds = array<i64: 1, 128>}, {transform_indices = @transform_7, window_bounds = array<i64: 1, 8, 128>}]} {
    %cst = arith.constant 0.000000e+00 : f32
    %0 = vector.broadcast %cst : f32 to vector<72x128xf32>
    %c0 = arith.constant 0 : index
    %c0_0 = arith.constant 0 : index
    %1 = vector.load %arg9[%c0, %c0_0] : memref<72x128xf32, #tpu.memory_space<vmem>>, vector<72x128xf32>
    tpu.vector_store %arg9[%c0, %c0_0], %0 {strides = array<i32>} : memref<72x128xf32, #tpu.memory_space<vmem>>, vector<72x128xf32>,
    %c0_1 = arith.constant 0 : index
    %c0_2 = arith.constant 0 : index
    %c0_3 = arith.constant 0 : index
    %2 = vector.load %arg1[%c0_1, %c0_2, %c0_3] : memref<1x32x81xf32, #tpu.memory_space<vmem>>, vector<1x8x71xf32>
    %3 = vector.shape_cast %2 : vector<1x8x71xf32> to vector<8x71xf32>
    %c0_4 = arith.constant 0 : index
    %c0_5 = arith.constant 0 : index
    %4 = vector.load %arg9[%c0_4, %c0_5] : memref<72x128xf32, #tpu.memory_space<vmem>>, vector<8x71xf32>
    tpu.vector_store %arg9[%c0_4, %c0_5], %3 {strides = array<i32>} : memref<72x128xf32, #tpu.memory_space<vmem>>, vector<8x71xf32>,
    %c0_6 = arith.constant 0 : index
    %c8 = arith.constant 8 : index
    %c0_7 = arith.constant 0 : index
    %5 = vector.load %arg1[%c0_6, %c8, %c0_7] : memref<1x32x81xf32, #tpu.memory_space<vmem>>, vector<1x8x71xf32>
    %6 = vector.shape_cast %5 : vector<1x8x71xf32> to vector<8x71xf32>
    %c8_8 = arith.constant 8 : index
    %c0_9 = arith.constant 0 : index
    %7 = vector.load %arg9[%c8_8, %c0_9] : memref<72x128xf32, #tpu.memory_space<vmem>>, vector<8x71xf32>
    tpu.vector_store %arg9[%c8_8, %c0_9], %6 {strides = array<i32>} : memref<72x128xf32, #tpu.memory_space<vmem>>, vector<8x71xf32>,
    %c0_10 = arith.constant 0 : index
    %c0_11 = arith.constant 0 : index
    %c1 = arith.constant 1 : index
    %8 = vector.load %arg1[%c0_10, %c0_11, %c1] : memref<1x32x81xf32, #tpu.memory_space<vmem>>, vector<1x8x71xf32>
    %9 = vector.shape_cast %8 : vector<1x8x71xf32> to vector<8x71xf32>
    %c16 = arith.constant 16 : index
    %c0_12 = arith.constant 0 : index
    %10 = vector.load %arg9[%c16, %c0_12] : memref<72x128xf32, #tpu.memory_space<vmem>>, vector<8x71xf32>
    tpu.vector_store %arg9[%c16, %c0_12], %9 {strides = array<i32>} : memref<72x128xf32, #tpu.memory_space<vmem>>, vector<8x71xf32>,
    %c0_13 = arith.constant 0 : index
    %c16_14 = arith.constant 16 : index
    %c0_15 = arith.constant 0 : index
    %11 = vector.load %arg1[%c0_13, %c16_14, %c0_15] : memref<1x32x81xf32, #tpu.memory_space<vmem>>, vector<1x8x71xf32>
    %12 = vector.shape_cast %11 : vector<1x8x71xf32> to vector<8x71xf32>
    %c24 = arith.constant 24 : index
    %c0_16 = arith.constant 0 : index
    %13 = vector.load %arg9[%c24, %c0_16] : memref<72x128xf32, #tpu.memory_space<vmem>>, vector<8x71xf32>
    tpu.vector_store %arg9[%c24, %c0_16], %12 {strides = array<i32>} : memref<72x128xf32, #tpu.memory_space<vmem>>, vector<8x71xf32>,
    %c0_17 = arith.constant 0 : index
    %c24_18 = arith.constant 24 : index
    %c0_19 = arith.constant 0 : index
    %14 = vector.load %arg1[%c0_17, %c24_18, %c0_19] : memref<1x32x81xf32, #tpu.memory_space<vmem>>, vector<1x8x71xf32>
    %15 = vector.shape_cast %14 : vector<1x8x71xf32> to vector<8x71xf32>
    %c32 = arith.constant 32 : index
    %c0_20 = arith.constant 0 : index
    %16 = vector.load %arg9[%c32, %c0_20] : memref<72x128xf32, #tpu.memory_space<vmem>>, vector<8x71xf32>
    tpu.vector_store %arg9[%c32, %c0_20], %15 {strides = array<i32>} : memref<72x128xf32, #tpu.memory_space<vmem>>, vector<8x71xf32>,
    %c0_21 = arith.constant 0 : index
    %c16_22 = arith.constant 16 : index
    %c1_23 = arith.constant 1 : index
    %17 = vector.load %arg1[%c0_21, %c16_22, %c1_23] : memref<1x32x81xf32, #tpu.memory_space<vmem>>, vector<1x8x71xf32>
    %18 = vector.shape_cast %17 : vector<1x8x71xf32> to vector<8x71xf32>
    %c40 = arith.constant 40 : index
    %c0_24 = arith.constant 0 : index
    %19 = vector.load %arg9[%c40, %c0_24] : memref<72x128xf32, #tpu.memory_space<vmem>>, vector<8x71xf32>
    tpu.vector_store %arg9[%c40, %c0_24], %18 {strides = array<i32>} : memref<72x128xf32, #tpu.memory_space<vmem>>, vector<8x71xf32>,
    %c0_25 = arith.constant 0 : index
    %c0_26 = arith.constant 0 : index
    %c9 = arith.constant 9 : index
    %20 = vector.load %arg1[%c0_25, %c0_26, %c9] : memref<1x32x81xf32, #tpu.memory_space<vmem>>, vector<1x8x71xf32>
    %21 = vector.shape_cast %20 : vector<1x8x71xf32> to vector<8x71xf32>
    %c48 = arith.constant 48 : index
    %c0_27 = arith.constant 0 : index
    %22 = vector.load %arg9[%c48, %c0_27] : memref<72x128xf32, #tpu.memory_space<vmem>>, vector<8x71xf32>
    tpu.vector_store %arg9[%c48, %c0_27], %21 {strides = array<i32>} : memref<72x128xf32, #tpu.memory_space<vmem>>, vector<8x71xf32>,
    %c0_28 = arith.constant 0 : index
    %c8_29 = arith.constant 8 : index
    %c9_30 = arith.constant 9 : index
    %23 = vector.load %arg1[%c0_28, %c8_29, %c9_30] : memref<1x32x81xf32, #tpu.memory_space<vmem>>, vector<1x8x71xf32>
    %24 = vector.shape_cast %23 : vector<1x8x71xf32> to vector<8x71xf32>
    %c56 = arith.constant 56 : index
    %c0_31 = arith.constant 0 : index
    %25 = vector.load %arg9[%c56, %c0_31] : memref<72x128xf32, #tpu.memory_space<vmem>>, vector<8x71xf32>
    tpu.vector_store %arg9[%c56, %c0_31], %24 {strides = array<i32>} : memref<72x128xf32, #tpu.memory_space<vmem>>, vector<8x71xf32>,
    %c0_32 = arith.constant 0 : index
    %c0_33 = arith.constant 0 : index
    %c10 = arith.constant 10 : index
    %26 = vector.load %arg1[%c0_32, %c0_33, %c10] : memref<1x32x81xf32, #tpu.memory_space<vmem>>, vector<1x8x71xf32>
    %27 = vector.shape_cast %26 : vector<1x8x71xf32> to vector<8x71xf32>
    %c64 = arith.constant 64 : index
    %c0_34 = arith.constant 0 : index
    %28 = vector.load %arg9[%c64, %c0_34] : memref<72x128xf32, #tpu.memory_space<vmem>>, vector<8x71xf32>
    tpu.vector_store %arg9[%c64, %c0_34], %27 {strides = array<i32>} : memref<72x128xf32, #tpu.memory_space<vmem>>, vector<8x71xf32>,
    %c0_35 = arith.constant 0 : index
    %c0_36 = arith.constant 0 : index
    %29 = vector.load %arg2[%c0_35, %c0_36] : memref<8x72xf32, #tpu.memory_space<vmem>>, vector<8x72xf32>
    %c0_37 = arith.constant 0 : index
    %c0_38 = arith.constant 0 : index
    %30 = vector.load %arg9[%c0_37, %c0_38] : memref<72x128xf32, #tpu.memory_space<vmem>>, vector<72x128xf32>
    %cst_39 = arith.constant dense<0.000000e+00> : vector<8x128xf32>
    %31 = tpu.matmul %29, %30, %cst_39 {dimension_numbers = #tpu.dot_dimension_numbers<[1], [0], [0], [1], [0, 0, 1, 1], [], []>} : vector<8x72xf32>, vector<72x128xf32>, vector<8x128xf32> -> vector<8x128xf32>
    %c0_40 = arith.constant 0 : index
    %c0_41 = arith.constant 0 : index
    %32 = vector.load %arg3[%c0_40, %c0_41] : memref<8x1xf32, #tpu.memory_space<vmem>>, vector<8x1xf32>
    %c0_42 = arith.constant 0 : index
    %c0_43 = arith.constant 0 : index
    %33 = vector.load %arg7[%c0_42, %c0_43] : memref<1x128xf32, #tpu.memory_space<vmem>>, vector<1x128xf32>
    %34 = vector.broadcast %33 : vector<1x128xf32> to vector<8x128xf32>
    %35 = arith.mulf %31, %34 : vector<8x128xf32>
    %cst_44 = arith.constant dense<0.000000e+00> : vector<8xf32>
    %36 = vector.multi_reduction <add>, %35, %cst_44 [1] : vector<8x128xf32> to vector<8xf32>
    %37 = vector.shape_cast %36 : vector<8xf32> to vector<8x1xf32>
    %38 = arith.mulf %35, %35 : vector<8x128xf32>
    %cst_45 = arith.constant dense<0.000000e+00> : vector<8xf32>
    %39 = vector.multi_reduction <add>, %38, %cst_45 [1] : vector<8x128xf32> to vector<8xf32>
    %40 = vector.shape_cast %39 : vector<8xf32> to vector<8x1xf32>
    %cst_46 = arith.constant 6.400000e+01 : f32
    %41 = vector.broadcast %cst_46 : f32 to vector<8x1xf32>
    %42 = arith.mulf %41, %32 : vector<8x1xf32>
    %43 = arith.addf %37, %42 : vector<8x1xf32>
    %cst_47 = arith.constant 2.000000e+00 : f32
    %44 = vector.broadcast %cst_47 : f32 to vector<8x1xf32>
    %45 = arith.mulf %44, %32 : vector<8x1xf32>
    %46 = arith.mulf %45, %37 : vector<8x1xf32>
    %47 = arith.addf %40, %46 : vector<8x1xf32>
    %48 = arith.mulf %32, %32 : vector<8x1xf32>
    %cst_48 = arith.constant 6.400000e+01 : f32
    %49 = vector.broadcast %cst_48 : f32 to vector<8x1xf32>
    %50 = arith.mulf %49, %48 : vector<8x1xf32>
    %51 = arith.addf %47, %50 : vector<8x1xf32>
    %c0_49 = arith.constant 0 : index
    %c0_50 = arith.constant 0 : index
    %52 = vector.load %arg6[%c0_49, %c0_50] : memref<8x8xf32, #tpu.memory_space<vmem>>, vector<8x8xf32>
    %cst_51 = arith.constant dense<0.000000e+00> : vector<8x1xf32>
    %53 = tpu.matmul %52, %43, %cst_51 {dimension_numbers = #tpu.dot_dimension_numbers<[1], [0], [0], [1], [0, 0, 1, 1], [], []>} : vector<8x8xf32>, vector<8x1xf32>, vector<8x1xf32> -> vector<8x1xf32>
    %cst_52 = arith.constant 7.812500e-03 : f32
    %54 = vector.broadcast %cst_52 : f32 to vector<8x1xf32>
    %55 = arith.mulf %53, %54 : vector<8x1xf32>
    %c0_53 = arith.constant 0 : index
    %c0_54 = arith.constant 0 : index
    %56 = vector.load %arg6[%c0_53, %c0_54] : memref<8x8xf32, #tpu.memory_space<vmem>>, vector<8x8xf32>
    %cst_55 = arith.constant dense<0.000000e+00> : vector<8x1xf32>
    %57 = tpu.matmul %56, %51, %cst_55 {dimension_numbers = #tpu.dot_dimension_numbers<[1], [0], [0], [1], [0, 0, 1, 1], [], []>} : vector<8x8xf32>, vector<8x1xf32>, vector<8x1xf32> -> vector<8x1xf32>
    %cst_56 = arith.constant 7.812500e-03 : f32
    %58 = vector.broadcast %cst_56 : f32 to vector<8x1xf32>
    %59 = arith.mulf %57, %58 : vector<8x1xf32>
    %60 = arith.mulf %55, %55 : vector<8x1xf32>
    %61 = arith.subf %59, %60 : vector<8x1xf32>
    %c0_57 = arith.constant 0 : index
    %c0_58 = arith.constant 0 : index
    %62 = vector.load %arg4[%c0_57, %c0_58] : memref<8x1xf32, #tpu.memory_space<vmem>>, vector<8x1xf32>
    %cst_59 = arith.constant 9.99999974E-6 : f32
    %63 = vector.broadcast %cst_59 : f32 to vector<8x1xf32>
    %64 = arith.addf %61, %63 : vector<8x1xf32>
    %65 = math.rsqrt %64 : vector<8x1xf32>
    %66 = arith.mulf %62, %65 : vector<8x1xf32>
    %67 = arith.subf %32, %55 : vector<8x1xf32>
    %68 = arith.mulf %67, %66 : vector<8x1xf32>
    %c0_60 = arith.constant 0 : index
    %c0_61 = arith.constant 0 : index
    %69 = vector.load %arg5[%c0_60, %c0_61] : memref<8x1xf32, #tpu.memory_space<vmem>>, vector<8x1xf32>
    %70 = arith.addf %68, %69 : vector<8x1xf32>
    %71 = vector.broadcast %66 : vector<8x1xf32> to vector<8x128xf32>
    %72 = arith.mulf %31, %71 : vector<8x128xf32>
    %73 = vector.broadcast %70 : vector<8x1xf32> to vector<8x128xf32>
    %74 = arith.addf %72, %73 : vector<8x128xf32>
    %cst_62 = arith.constant 2.000000e-01 : f32
    %75 = vector.broadcast %cst_62 : f32 to vector<8x128xf32>
    %76 = arith.mulf %75, %74 : vector<8x128xf32>
    %77 = arith.maximumf %74, %76 : vector<8x128xf32>
    %c0_63 = arith.constant 0 : index
    %c0_64 = arith.constant 0 : index
    %c0_65 = arith.constant 0 : index
    %78 = vector.load %arg8[%c0_63, %c0_64, %c0_65] : memref<1x8x128xf32, #tpu.memory_space<vmem>>, vector<1x8x128xf32>
    %79 = vector.shape_cast %78 : vector<1x8x128xf32> to vector<8x128xf32>
    %80 = vector.shape_cast %77 : vector<8x128xf32> to vector<1x8x128xf32>
    tpu.vector_store %arg8[%c0_63, %c0_64, %c0_65], %80 {strides = array<i32>} : memref<1x8x128xf32, #tpu.memory_space<vmem>>, vector<1x8x128xf32>,
    return
  }
  func.func @transform_0(%arg0: i32) -> (i32, i32, i32) {
    %c0_i32 = arith.constant 0 : i32
    %c0_i32_0 = arith.constant 0 : i32
    %c0_i32_1 = arith.constant 0 : i32
    return %arg0, %c0_i32, %c0_i32_0 : i32, i32, i32
  }
  func.func @transform_1(%arg0: i32) -> (i32, i32) {
    %c0_i32 = arith.constant 0 : i32
    %c0_i32_0 = arith.constant 0 : i32
    %c0_i32_1 = arith.constant 0 : i32
    return %c0_i32, %c0_i32_0 : i32, i32
  }
  func.func @transform_2(%arg0: i32) -> (i32, i32) {
    %c0_i32 = arith.constant 0 : i32
    %c0_i32_0 = arith.constant 0 : i32
    %c0_i32_1 = arith.constant 0 : i32
    return %c0_i32, %c0_i32_0 : i32, i32
  }
  func.func @transform_3(%arg0: i32) -> (i32, i32) {
    %c0_i32 = arith.constant 0 : i32
    %c0_i32_0 = arith.constant 0 : i32
    %c0_i32_1 = arith.constant 0 : i32
    return %c0_i32, %c0_i32_0 : i32, i32
  }
  func.func @transform_4(%arg0: i32) -> (i32, i32) {
    %c0_i32 = arith.constant 0 : i32
    %c0_i32_0 = arith.constant 0 : i32
    %c0_i32_1 = arith.constant 0 : i32
    return %c0_i32, %c0_i32_0 : i32, i32
  }
  func.func @transform_5(%arg0: i32) -> (i32, i32) {
    %c0_i32 = arith.constant 0 : i32
    %c0_i32_0 = arith.constant 0 : i32
    %c0_i32_1 = arith.constant 0 : i32
    return %c0_i32, %c0_i32_0 : i32, i32
  }
  func.func @transform_6(%arg0: i32) -> (i32, i32) {
    %c0_i32 = arith.constant 0 : i32
    %c0_i32_0 = arith.constant 0 : i32
    %c0_i32_1 = arith.constant 0 : i32
    return %c0_i32, %c0_i32_0 : i32, i32
  }
  func.func @transform_7(%arg0: i32) -> (i32, i32, i32) {
    %c0_i32 = arith.constant 0 : i32
    %c0_i32_0 = arith.constant 0 : i32
    %c0_i32_1 = arith.constant 0 : i32
    return %arg0, %c0_i32, %c0_i32_0 : i32, i32, i32
  }
}

</mosaic_0001>

<bundles_post_ra>
// kernel: dcgan_conv_forward.1
= control target key start
LH: loop header
LB: loop body
LE: loop exit
PB: predicated region body
PF: predicated region fallthrough
CT: control target
= control target key end

     0   :  { %s788_s24 = smov 0   ;;  %s862_s0 = inlined_call_operand.vmem [shape: f32[2,32,81], index: 0, kind: input, shape index: {}]   ;;  %s863_s1 = inlined_call_operand.vmem [shape: f32[8,72], index: 1, kind: input, shape index: {}]   ;;  %s864_s2 = inlined_call_operand.vmem [shape: f32[8,1], index: 2, kind: input, shape index: {}]   ;;  %s865_s3 = inlined_call_operand.vmem [shape: f32[8,1], index: 3, kind: input, shape index: {}]   ;;  %s866_s4 = inlined_call_operand.vmem [shape: f32[8,1], index: 4, kind: input, shape index: {}]   ;;  %s867_s5 = inlined_call_operand.vmem [shape: f32[8,8], index: 5, kind: input, shape index: {}]   ;;  %s868_s6 = inlined_call_operand.vmem [shape: f32[1,128], index: 6, kind: input, shape index: {}]   ;;  %s869_s7 = inlined_call_operand.vmem [shape: f32[2,8,128], index: 7, kind: output, shape index: {}]  }
   0x1 LB: > { %s656_s25 = sadd.s32 4294967295, %s740_s24   ;;  %p660_p0 = scmp.ge.s32.totalorder %s740_s24, 1  ;;  %s740_s24 = sphi %s788_s24, %s17_s24  }
   0x2   : > { %p237_p1 = scmp.lt.s32.totalorder %s740_s24, 3 }
   0x4   : > { %p238_p2 = pnand %p660_p0, %p237_p1 }
   0x5   : > { %p268_p3 = scmp.lt.s32.totalorder (!%p238_p2), %s656_s25, 1  ;;  %s743_s30 = smov (!%p238_p2), 118  }
   0x6   : > { %241 = sbr.rel (%p238_p2) target bundleno = 847 (0x34f), region = 48  ;;  %s744_s8 = smov (!%p238_p2), 119  }
   0x7   : > { %s745_s9 = smov (!%p238_p2), 127  }
   0xb   : > { %v742_v0 = vmov 0.0   ;;  %s871_s25 = smov (!%p268_p3, %s656_s25), 1  ;;  %vm287_vm0 = vcmask 580608   ;;  %vm746_vm1 = vmmov 0   ;;  %v325_v19 = vld [vmem:[%s863_s1] sm:$0xff]  ;;  %vm335_vm2 = vcmask 588800  }
   0xc   : > { %285 = vst [vmem:[#allocation2 + $0x40] sm:$0xff] %v742_v0  ;;  %277 = vst [vmem:[#allocation2] sm:$0xff] %v742_v0  ;;  %685 = vmatprep.subr.mxu0 %v742_v0  ;;  %706 = vmatprep.subr.mxu1 %v742_v0  ;;  %s670_s26 = sshll.u32 %s871_s25, 5  ;;  %v665_v20 = vld [vmem:[%s868_s6] ss:$0 sm:$0xff]  ;;  %vm432_vm3 = vcmask 64512  }
   0xd   : > { %278 = vst [vmem:[#allocation2 + $0x8] sm:$0xff] %v742_v0  ;;  %279 = vst [vmem:[#allocation2 + $0x10] sm:$0xff] %v742_v0  ;;  %s272_s29 = scalar_lea.vmem %s862_s0, %s670_s26  ;;  %703 = vmatprep.mubr.msk.f32.mxu0 %vm746_vm1, %v742_v0  ;;  %708 = vmatprep.mubr.msk.f32.mxu1 %vm746_vm1, %v742_v0  ;;  %v409_v25 = vld [vmem:[%s864_s2] sm:$0xff]  ;;  %v747_v37 = vmov 0   ;;  %s663_s22 = sshll.u32 %s871_s25, 3 }
   0xe   : > { %280 = vst [vmem:[#allocation2 + $0x18] sm:$0xff] %v742_v0  ;;  %281 = vst [vmem:[#allocation2 + $0x20] sm:$0xff] %v742_v0  ;;  %v319_v1 = vld [vmem:[%s272_s29] sm:$0xff]  ;;  %v313_v2 = vld [vmem:[%s272_s29 + $0x8] sm:$0xff]  ;;  %v425_v26 = vmul.f32 2.0, %v409_v25  ;;  %v428_v27 = vmul.f32 %v409_v25, %v409_v25  ;;  %v423_v28 = vmul.f32 64.0, %v409_v25  ;;  %730 = vset.pattern.permute.xlu0 %v747_v37  ;;  %731 = vset.pattern.permute.xlu1 %v747_v37  ;;  %s276_s27 = scalar_lea.vmem %s869_s7, %s663_s22 }
   0xf   : > { %282 = vst [vmem:[#allocation2 + $0x28] sm:$0xff] %v742_v0  ;;  %283 = vst [vmem:[#allocation2 + $0x30] sm:$0xff] %v742_v0  ;;  %v301_v3 = vld [vmem:[%s272_s29 + $0x10] sm:$0xff]  ;;  %321 = vrot.lane.b32.xlu0 %v319_v1, %s743_s30  ;;  %309 = vrot.lane.b32.xlu1 %v319_v1, %s744_s8  ;;  %v299_v4 = vld [vmem:[%s272_s29 + $0x18] sm:$0xff] }
  0x10   : > { %284 = vst [vmem:[#allocation2 + $0x38] sm:$0xff] %v742_v0  ;;  %298 = vst.msk [vmem:[#allocation2 + $0x18] sm:$0xff] %vm287_vm0, %v301_v3  ;;  %v429_v31 = vmul.f32 64.0, %v428_v27  ;;  %v431_v33 = vld [vmem:[%s867_s5] sm:$0xff] }
  0x11   : > { %290 = vst.msk [vmem:[#allocation2 + $0x8] sm:$0xff] %vm287_vm0, %v313_v2  ;;  %288 = vst.msk [vmem:[#allocation2] sm:$0xff] %vm287_vm0, %v319_v1  ;;  %v580_v47 = vld [vmem:[%s865_s3] sm:$0xff] }
  0x12   : > { %300 = vst.msk [vmem:[#allocation2 + $0x20] sm:$0xff] %vm287_vm0, %v299_v4  ;;  %v586_v51 = vld [vmem:[%s866_s4] sm:$0xff] }
  0x13   : > { %315 = vrot.lane.b32.xlu0 %v313_v2, %s744_s8  ;;  %303 = vrot.lane.b32.xlu1 %v301_v3, %s745_s9 }
  0x17   : > { %293 = vrot.lane.b32.xlu0 %v319_v1, %s745_s9  ;;  %v329_v15 = vld [vmem:[#allocation2 + $0x18] sm:$0xff] }
  0x18   : > { %v327_v17 = vld [vmem:[#allocation2 + $0x8] sm:$0xff]  ;;  %v326_v18 = vld [vmem:[#allocation2] sm:$0xff] }
  0x19   : > { %v330_v14 = vld [vmem:[#allocation2 + $0x20] sm:$0xff] }
  0x81   : > { %v322_v5 = vpop.permute.xlu0 %321  ;;  %v310_v6 = vpop.permute.xlu1 %309 }
  0x82   : > { %324 = vst.msk [vmem:[#allocation2 + $0x40] sm:$0xff] %vm287_vm0, %v322_v5  ;;  %312 = vst.msk [vmem:[#allocation2 + $0x30] sm:$0xff] %vm287_vm0, %v310_v6 }
  0x85   : > { %v316_v7 = vpop.permute.xlu0 %315  ;;  %v304_v8 = vpop.permute.xlu1 %303 }
  0x86   : > { %318 = vst.msk [vmem:[#allocation2 + $0x38] sm:$0xff] %vm287_vm0, %v316_v7  ;;  %306 = vst.msk [vmem:[#allocation2 + $0x28] sm:$0xff] %vm287_vm0, %v304_v8 }
  0x89   : > { %v334_v9 = vld [vmem:[#allocation2 + $0x40] sm:$0xff]  ;;  %v294_v10 = vpop.permute.xlu0 %293  ;;  %v332_v12 = vld [vmem:[#allocation2 + $0x30] sm:$0xff] }
  0x8a   : > { %686 = vmatpush3.msra.mxu0 %v334_v9  ;;  %296 = vst.msk [vmem:[#allocation2 + $0x10] sm:$0xff] %vm287_vm0, %v294_v10 }
  0x8b   : > { %687 = vmatprep.subr.mxu0 %v742_v0 }
  0x8d   : > { %v333_v11 = vld [vmem:[#allocation2 + $0x38] sm:$0xff]  ;;  %v331_v13 = vld [vmem:[#allocation2 + $0x28] sm:$0xff] }
  0x8e   : > { %688 = vmatpush3.msra.mxu0 %v333_v11 }
  0x8f   : > { %689 = vmatprep.subr.mxu0 %v742_v0 }
  0x90   : > { %690 = vmatpush3.msra.mxu0 %v332_v12 }
  0x91   : > { %691 = vmatprep.subr.mxu0 %v742_v0  ;;  %v328_v16 = vld [vmem:[#allocation2 + $0x10] sm:$0xff] }
  0x92   : > { %692 = vmatpush3.msra.mxu0 %v331_v13 }
  0x93   : > { %693 = vmatprep.subr.mxu0 %v742_v0 }
  0x94   : > { %694 = vmatpush3.msra.mxu0 %v330_v14 }
  0x95   : > { %695 = vmatprep.subr.mxu0 %v742_v0 }
  0x96   : > { %696 = vmatpush3.msra.mxu0 %v329_v15 }
  0x97   : > { %697 = vmatprep.subr.mxu0 %v742_v0 }
  0x98   : > { %698 = vmatpush3.msra.mxu0 %v328_v16 }
  0x99   : > { %699 = vmatprep.subr.mxu0 %v742_v0 }
  0x9a   : > { %700 = vmatpush3.msra.mxu0 %v327_v17 }
  0x9b   : > { %701 = vmatprep.subr.mxu0 %v742_v0 }
  0x9c   : > { %702 = vmatpush3.msra.mxu0 %v326_v18 }
  0x9d   : > { %704 = vmatmul.mubr.msk.f32.vlgmr.msra.gmra.mxu0 %vm335_vm2, %v325_v19 }
 0x15d   : > { %v405_v21 = vpop.f32.mrf.mxu0 }
 0x15e   : > { %v417_v22 = vmul.f32 %v665_v20, %v405_v21 }
 0x15f   : > { %v705_v23 = vpop.f32.mrf.mxu0 }
 0x160   : > { %418 = vadd.xlane.f32.xlu1 %v417_v22  ;;  %v420_v24 = vmul.f32 %v417_v22, %v417_v22 }
 0x162   : > { %421 = vadd.xlane.f32.xlu0 %v420_v24 }
 0x1e9   : > { %v419_v29 = vpop.xlane.xlu1 %418 }
 0x1ea   : > { %v426_v30 = vmul.f32 %v425_v26, %v419_v29  ;;  %v424_v32 = vadd.f32 %v423_v28, %v419_v29 }
 0x1eb   : > { %v422_v34 = vpop.xlane.xlu0 %421 }
 0x1ec   : > { %v427_v35 = vadd.f32 %v426_v30, %v422_v34  ;;  %707 = vmatpush3.msra.mxu1 %v424_v32 }
 0x1ed   : > { %709 = vmatmul.mubr.msk.f32.vlgmr.msra.gmra.mxu1 %vm432_vm3, %v431_v33  ;;  %711 = vmatprep.subr.mxu1 %v742_v0 }
 0x1ee   : > { %v430_v36 = vadd.f32 %v429_v31, %v427_v35  ;;  %713 = vmatprep.mubr.msk.f32.mxu1 %vm746_vm1, %v742_v0 }
 0x1f0   : > { %712 = vmatpush3.msra.mxu1 %v430_v36 }
 0x1f1   : > { %714 = vmatmul.mubr.msk.f32.vlgmr.msra.gmra.mxu1 %vm432_vm3, %v431_v33 }
 0x2ad   : > { %v502_v38 = vpop.f32.mrf.mxu1 }
 0x2ae   : > { %v506_v39 = vmul.f32 0.0078125, %v502_v38 }
 0x2af   : > { %v710_v40 = vpop.f32.mrf.mxu1 }
 0x2b0   : > { %v578_v42 = vmul.f32 %v506_v39, %v506_v39  ;;  %v584_v49 = vsub.f32 %v409_v25, %v506_v39 }
 0x2b1   : > { %v573_v41 = vpop.f32.mrf.mxu1 }
 0x2b2   : > { %v577_v43 = vmul.f32 0.0078125, %v573_v41 }
 0x2b3   : > { %v715_v44 = vpop.f32.mrf.mxu1 }
 0x2b4   : > { %v579_v45 = vsub.f32 %v577_v43, %v578_v42 }
 0x2b6   : > { %v581_v46 = vadd.f32 1e-05, %v579_v45 }
 0x2b8   : > { %732 = vrsqrt.f32 %v581_v46 }
 0x2c5   : > { %v733_v48 = vpop.eup %732 }
 0x2c6   : > { %v583_v50 = vmul.f32 %v733_v48, %v580_v47 }
 0x2c8   : > { %590 = vperm.xlu0 %730, %v583_v50   ;;  %v585_v52 = vmul.f32 %v584_v49, %v583_v50 }
 0x2ca   : > { %v587_v53 = vadd.f32 %v586_v51, %v585_v52 }
 0x2cc   : > { %596 = vperm.xlu1 %731, %v587_v53  }
 0x343   : > { %v591_v54 = vpop.permute.xlu0 %590 }
 0x344   : > { %v593_v55 = vmul.f32 %v591_v54, %v405_v21 }
 0x347   : > { %v597_v56 = vpop.permute.xlu1 %596 }
 0x348   : > { %v599_v57 = vadd.f32 %v597_v56, %v593_v55 }
 0x34a   : > { %v600_v58 = vmul.f32 0.2, %v599_v57 }
 0x34c   : > { %v601_v59 = vmax.f32 %v599_v57, %v600_v58 }
 0x34e   : > { %602 = vst [vmem:[%s276_s27] sm:$0xff] %v601_v59 }
 0x34f PF: > { %s17_s24 = sadd.s32 1, %s740_s24  }
 0x350   : > { %p14_p4 = scmp.ge.s32.totalorder %s17_s24, 4  }
 0x352   :  { %16 = sbr.rel (!%p14_p4) target bundleno = 1 (0x1), region = 78 }

</bundles_post_ra>
